<compile_context>
chip_gen: v7x
topology: tpu7x:2x2x1
jax: 0.10.0
libtpu: 0.0.40
codegen_flags: <defaults>
</compile_context>

<pallas_src>
import math

import jax
import jax.numpy as jnp
from jax.experimental import pallas as pl
from jax.experimental.pallas import tpu as pltpu

_LANE = 128               # lane width: hidden / feature / logit dims pad to this
_TILE_CAP = 512           # hop / XW row+reduction tile cap (review: 512-1024)
_TILE_E_CAP = 512         # edge-row tile cap for the predictor MLP
_RESIDENT_BUDGET = 20 << 20   # v7x-safe VMEM budget for the resident-H hop path
                              # (64 MiB physical / 32 MiB default scoped)


def _round_up(x, m):
    return ((x + m - 1) // m) * m


def _pad2(a, rows, cols):
    return jnp.pad(a, ((0, rows - a.shape[0]), (0, cols - a.shape[1])))


def _choose_tile(dim_pad, cap):
    """Largest multiple of 128 that divides dim_pad and is <= cap."""
    t = min(cap, dim_pad)
    t -= t % 128
    t = max(t, 128)
    while dim_pad % t:
        t -= 128
    return t


def _choose_row_tile(dim_pad, cap):
    """Row tile; prefer >= 2 blocks so the 'parallel' axis can shard across
    v7x's 2 TensorCores (no-op on v5e/v6e)."""
    t = _choose_tile(dim_pad, cap)
    if dim_pad // t < 2 and dim_pad > 128:
        t = _choose_tile(dim_pad, dim_pad // 2)
    return t


# --------------------------------------------------------------------------
# SGConv: H_out = (D^-1/2 (A + I) D^-1/2)^k  X  W + b
# Reordered as  H0 = X W ;  H = A_norm @ H (k times) ;  H_out = H + b
# All matmuls: bf16 operands on the MXU, f32 accumulation.
# --------------------------------------------------------------------------
def _xw_kernel(x_ref, w_ref, out_ref):
    out_ref[...] = jnp.dot(
        x_ref[...], w_ref[...], preferred_element_type=jnp.float32
    ).astype(out_ref.dtype)


# Resident-H hop kernels: whole H stays in VMEM (constant index_map), no
# reduction grid axis, no accumulator scratch.
def _hop_res_kernel(a_ref, h_ref, out_ref):
    out_ref[...] = jnp.dot(
        a_ref[...], h_ref[...], preferred_element_type=jnp.float32
    ).astype(out_ref.dtype)


def _hop_res_bias_kernel(a_ref, h_ref, b_ref, out_ref):
    r = jnp.dot(a_ref[...], h_ref[...], preferred_element_type=jnp.float32)
    out_ref[...] = (r + b_ref[...]).astype(out_ref.dtype)


# Tiled hop kernels (large graphs): reduction axis last, f32 VMEM accumulator.
def _hop_tiled_kernel(a_ref, h_ref, out_ref, acc_ref):
    @pl.when(pl.program_id(1) == 0)
    def _():
        acc_ref[...] = jnp.zeros_like(acc_ref)

    acc_ref[...] += jnp.dot(
        a_ref[...], h_ref[...], preferred_element_type=jnp.float32
    )

    @pl.when(pl.program_id(1) == pl.num_programs(1) - 1)
    def _():
        out_ref[...] = acc_ref[...].astype(out_ref.dtype)


def _hop_tiled_bias_kernel(a_ref, h_ref, b_ref, out_ref, acc_ref):
    @pl.when(pl.program_id(1) == 0)
    def _():
        acc_ref[...] = jnp.zeros_like(acc_ref)

    acc_ref[...] += jnp.dot(
        a_ref[...], h_ref[...], preferred_element_type=jnp.float32
    )

    @pl.when(pl.program_id(1) == pl.num_programs(1) - 1)
    def _():
        out_ref[...] = (acc_ref[...] + b_ref[...]).astype(out_ref.dtype)


def _resident_bytes(tm, n_pad, h_pad):
    a = 2 * tm * n_pad * 2          # double-buffered bf16 A row tile
    h = n_pad * h_pad * 2           # resident bf16 H (constant block index)
    o = 2 * tm * h_pad * 2          # double-buffered bf16 out tile
    return a + h + o + h_pad * 4


def sgconv(a_pad_bf16, x_pad_bf16, w_pad_bf16, b_pad_f32, *, k_hop):
    """a_pad_bf16: [n_pad, n_pad] bf16; x_pad_bf16: [n_pad, f_pad] bf16;
    w_pad_bf16: [f_pad, h_pad] bf16; b_pad_f32: [1, h_pad] f32.
    Returns H: [n_pad, h_pad] bf16."""
    n_pad, f_pad = x_pad_bf16.shape
    h_pad = w_pad_bf16.shape[1]
    tm = _choose_row_tile(n_pad, _TILE_CAP)

    par = pltpu.CompilerParams(dimension_semantics=("parallel",))

    # H0 = X @ W   (row-tiled; K = f_pad in a single block)
    h = pl.pallas_call(
        _xw_kernel,
        out_shape=jax.ShapeDtypeStruct((n_pad, h_pad), jnp.bfloat16),
        grid=(n_pad // tm,),
        in_specs=[
            pl.BlockSpec((tm, f_pad), lambda i: (i, 0)),
            pl.BlockSpec((f_pad, h_pad), lambda i: (0, 0)),
        ],
        out_specs=pl.BlockSpec((tm, h_pad), lambda i: (i, 0)),
        compiler_params=par,
    )(x_pad_bf16, w_pad_bf16)

    if k_hop == 0:  # degenerate case: just the linear layer
        return (h.astype(jnp.float32) + b_pad_f32).astype(jnp.bfloat16)

    resident = _resident_bytes(tm, n_pad, h_pad) <= _RESIDENT_BUDGET
    # NOTE: both paths fit the 32 MiB default scoped VMEM by construction
    # (resident path capped at 20 MiB, tiled path ~1.5 MiB at 512 tiles), so
    # vmem_limit_bytes is left at the default even on v7x.

    for hop in range(k_hop):
        last = hop == k_hop - 1
        if resident:
            in_specs = [
                pl.BlockSpec((tm, n_pad), lambda i: (i, 0)),        # A row tile
                pl.BlockSpec((n_pad, h_pad), lambda i: (0, 0)),     # resident H
            ]
            args = (a_pad_bf16, h)
            kern = _hop_res_kernel
            if last:
                in_specs.append(pl.BlockSpec((1, h_pad), lambda i: (0, 0)))
                args = args + (b_pad_f32,)
                kern = _hop_res_bias_kernel
            h = pl.pallas_call(
                kern,
                out_shape=jax.ShapeDtypeStruct((n_pad, h_pad), jnp.bfloat16),
                grid=(n_pad // tm,),
                in_specs=in_specs,
                out_specs=pl.BlockSpec((tm, h_pad), lambda i: (i, 0)),
                compiler_params=par,
            )(*args)
        else:
            tk = _choose_tile(n_pad, _TILE_CAP)
            in_specs = [
                pl.BlockSpec((tm, tk), lambda i, k: (i, k)),        # A tile
                pl.BlockSpec((tk, h_pad), lambda i, k: (k, 0)),     # H tile
            ]
            args = (a_pad_bf16, h)
            kern = _hop_tiled_kernel
            if last:
                in_specs.append(pl.BlockSpec((1, h_pad), lambda i, k: (0, 0)))
                args = args + (b_pad_f32,)
                kern = _hop_tiled_bias_kernel
            h = pl.pallas_call(
                kern,
                out_shape=jax.ShapeDtypeStruct((n_pad, h_pad), jnp.bfloat16),
                grid=(n_pad // tm, n_pad // tk),
                in_specs=in_specs,
                out_specs=pl.BlockSpec((tm, h_pad), lambda i, k: (i, 0)),
                scratch_shapes=[pltpu.VMEM((tm, h_pad), jnp.float32)],
                compiler_params=pltpu.CompilerParams(
                    dimension_semantics=("parallel", "arbitrary")
                ),
            )(*args)
    return h


# --------------------------------------------------------------------------
# Predictor: Linear -> ReLU -> Linear -> ReLU -> Linear(1), on h_src * h_dst.
# pos + neg edges handled in ONE call; bf16 operands on the MXU, f32 accumulate;
# the 1-logit head uses a 128-wide zero-padded w3 so stores stay lane-dense
# (real logit in column 0).
# --------------------------------------------------------------------------
def _predictor_kernel(hs_ref, hd_ref, w1, b1, w2, b2, w3, b3, out_ref):
    z = hs_ref[...] * hd_ref[...]                                   # bf16
    z = jnp.dot(z, w1[...], preferred_element_type=jnp.float32) + b1[...]
    z = jnp.maximum(z, 0.0).astype(jnp.bfloat16)
    z = jnp.dot(z, w2[...], preferred_element_type=jnp.float32) + b2[...]
    z = jnp.maximum(z, 0.0).astype(jnp.bfloat16)
    out_ref[...] = (
        jnp.dot(z, w3[...], preferred_element_type=jnp.float32) + b3[...]
    )


def predict(h_src_pad, h_dst_pad, pp):
    e_pad, h_pad = h_src_pad.shape
    te = _choose_tile(e_pad, _TILE_E_CAP)
    out = pl.pallas_call(
        _predictor_kernel,
        out_shape=jax.ShapeDtypeStruct((e_pad, _LANE), jnp.float32),
        grid=(e_pad // te,),
        in_specs=[
            pl.BlockSpec((te, h_pad), lambda i: (i, 0)),
            pl.BlockSpec((te, h_pad), lambda i: (i, 0)),
            pl.BlockSpec((h_pad, h_pad), lambda i: (0, 0)),
            pl.BlockSpec((1, h_pad), lambda i: (0, 0)),
            pl.BlockSpec((h_pad, h_pad), lambda i: (0, 0)),
            pl.BlockSpec((1, h_pad), lambda i: (0, 0)),
            pl.BlockSpec((h_pad, _LANE), lambda i: (0, 0)),
            pl.BlockSpec((1, _LANE), lambda i: (0, 0)),
        ],
        out_specs=pl.BlockSpec((te, _LANE), lambda i: (i, 0)),
        compiler_params=pltpu.CompilerParams(dimension_semantics=("parallel",)),
    )(h_src_pad, h_dst_pad, pp["w1"], pp["b1"], pp["w2"], pp["b2"],
      pp["w3"], pp["b3"])
    return out[:, 0:1]  # real logit is column 0


# --------------------------------------------------------------------------
# Glue: dense normalized adjacency (DGL add_self_loop + norm='both'),
# zero-padding to TPU-friendly shapes, and the full forward pass.
# --------------------------------------------------------------------------
def normalized_adjacency(src, dst, n):
    a = jnp.zeros((n, n), jnp.float32).at[dst, src].add(1.0)
    a = a + jnp.eye(n, dtype=jnp.float32)           # dgl.add_self_loop
    deg = jnp.maximum(a.sum(axis=1), 1.0)           # degrees (>=1 w/ self-loops)
    norm = jax.lax.rsqrt(deg)
    return norm[:, None] * a * norm[None, :]


def prepare_adjacency(block_edges, n, n_pad):
    """Build the padded bf16 normalized adjacency once; cache it across
    forwards when the graph is reused."""
    a_norm = normalized_adjacency(block_edges[0], block_edges[1], n)
    return _pad2(a_norm, n_pad, n_pad).astype(jnp.bfloat16)


def pad_params(p, f_pad, h_pad):
    # Zero-padding keeps the math exact: padded rows/cols contribute nothing.
    # Weights in bf16 for the MXU; biases stay f32 (added in the f32 accumulator).
    bf = jnp.bfloat16
    return dict(
        sg_w=_pad2(p["sg_w"], f_pad, h_pad).astype(bf),
        sg_b=_pad2(p["sg_b"], 1, h_pad),
        w1=_pad2(p["w1"], h_pad, h_pad).astype(bf), b1=_pad2(p["b1"], 1, h_pad),
        w2=_pad2(p["w2"], h_pad, h_pad).astype(bf), b2=_pad2(p["b2"], 1, h_pad),
        w3=_pad2(p["w3"], h_pad, _LANE).astype(bf), b3=_pad2(p["b3"], 1, _LANE),
    )


def sgc_forward(params, block_edges, pos_edges, neg_edges, x, *, k_hop,
                a_pad_bf16=None):
    n, f = x.shape
    n_hidden = params["sg_w"].shape[1]
    n_pad = _round_up(n, _LANE)
    f_pad = _round_up(f, _LANE)
    h_pad = _round_up(n_hidden, _LANE)

    pp = pad_params(params, f_pad, h_pad)

    if a_pad_bf16 is None:
        a_pad_bf16 = prepare_adjacency(block_edges, n, n_pad)
    x_pad = _pad2(x, n_pad, f_pad).astype(jnp.bfloat16)

    h = sgconv(a_pad_bf16, x_pad, pp["sg_w"], pp["sg_b"], k_hop=k_hop)  # bf16

    # Edge gathers (plain-JAX indexing glue, bf16); pos+neg fused into one call.
    src = jnp.concatenate([pos_edges[0], neg_edges[0]])
    dst = jnp.concatenate([pos_edges[1], neg_edges[1]])
    e = src.shape[0]
    e_pad = _round_up(e, _LANE)
    hs = _pad2(h[src], e_pad, h_pad)
    hd = _pad2(h[dst], e_pad, h_pad)

    scores = predict(hs, hd, pp)[:e]
    n_pos = pos_edges[0].shape[0]
    return scores[:n_pos], scores[n_pos:]


# --------------------------------------------------------------------------
# Deterministic parameter init (PyTorch-style uniform(-1/sqrt(fan_in), ...))
# --------------------------------------------------------------------------
def linear_init(key, fan_in, fan_out):
    kw, kb = jax.random.split(key)
    lim = 1.0 / math.sqrt(fan_in)
    w = jax.random.uniform(kw, (fan_in, fan_out), jnp.float32, -lim, lim)
    b = jax.random.uniform(kb, (1, fan_out), jnp.float32, -lim, lim)
    return w, b


def make_params(key, in_feats, n_hidden):
    k0, k1, k2, k3 = jax.random.split(key, 4)
    sg_w, sg_b = linear_init(k0, in_feats, n_hidden)
    w1, b1 = linear_init(k1, n_hidden, n_hidden)
    w2, b2 = linear_init(k2, n_hidden, n_hidden)
    w3, b3 = linear_init(k3, n_hidden, 1)
    return dict(sg_w=sg_w, sg_b=sg_b, w1=w1, b1=b1, w2=w2, b2=b2, w3=w3, b3=b3)


if __name__ == "__main__":
    N, IN_FEATS, N_HIDDEN, K_HOP = 64, 32, 32, 3
    E_BLOCK, E_POS, E_NEG = 256, 16, 16

    root = jax.random.PRNGKey(0)
    kx, ke, kp, kn, kw = jax.random.split(root, 5)

    x = jax.random.normal(kx, (N, IN_FEATS), jnp.float32)
    block_src = jax.random.randint(ke, (E_BLOCK,), 0, N)
    block_dst = jax.random.randint(jax.random.fold_in(ke, 1), (E_BLOCK,), 0, N)
    pos_src = jax.random.randint(kp, (E_POS,), 0, N)
    pos_dst = jax.random.randint(jax.random.fold_in(kp, 1), (E_POS,), 0, N)
    neg_src = jax.random.randint(kn, (E_NEG,), 0, N)
    neg_dst = jax.random.randint(jax.random.fold_in(kn, 1), (E_NEG,), 0, N)

    params = make_params(kw, IN_FEATS, N_HIDDEN)

    # Graph prep (adjacency build + pad + bf16 cast) hoisted out so it is done
    # once even if the forward is called repeatedly on the same graph.
    n_pad = _round_up(N, _LANE)
    a_pad_bf16 = prepare_adjacency((block_src, block_dst), N, n_pad)

    h_pos, h_neg = sgc_forward(
        params, (block_src, block_dst), (pos_src, pos_dst), (neg_src, neg_dst),
        x, k_hop=K_HOP, a_pad_bf16=a_pad_bf16,
    )
    jax.block_until_ready((h_pos, h_neg))

    # Pure-JAX f32 reference (precision=HIGHEST so the reference itself is
    # accurate on TPU).  The kernels run bf16 operands with f32 accumulation,
    # so compare with a loosened tolerance.
    hi = jax.lax.Precision.HIGHEST
    a_norm = normalized_adjacency(block_src, block_dst, N)
    h_ref = x
    for _ in range(K_HOP):
        h_ref = jnp.dot(a_norm, h_ref, precision=hi)
    h_ref = jnp.dot(h_ref, params["sg_w"], precision=hi) + params["sg_b"]

    def mlp_ref(z):
        z = jnp.maximum(jnp.dot(z, params["w1"], precision=hi) + params["b1"], 0.0)
        z = jnp.maximum(jnp.dot(z, params["w2"], precision=hi) + params["b2"], 0.0)
        return jnp.dot(z, params["w3"], precision=hi) + params["b3"]

    ref_pos = mlp_ref(h_ref[pos_src] * h_ref[pos_dst])
    ref_neg = mlp_ref(h_ref[neg_src] * h_ref[neg_dst])

    assert h_pos.shape == (E_POS, 1) and h_neg.shape == (E_NEG, 1)
    assert jnp.allclose(h_pos, ref_pos, atol=5e-2, rtol=5e-2), float(
        jnp.max(jnp.abs(h_pos - ref_pos)))
    assert jnp.allclose(h_neg, ref_neg, atol=5e-2, rtol=5e-2), float(
        jnp.max(jnp.abs(h_neg - ref_neg)))

    # TODO(synk): DGL sampling / DataLoader in `inference()` has no Pallas
    # equivalent; only the math (SGConv propagation + predictor MLP) is ported.
    print("KERNEL_OK")
</pallas_src>

<mosaic_0001>
module attributes {stable_mosaic.version = 11 : i64} {
  func.func @_xw_kernel(%arg0: i32, %arg1: memref<128x128xbf16, #tpu.memory_space<vmem>>, %arg2: memref<128x128xbf16, #tpu.memory_space<vmem>>, %arg3: memref<128x128xbf16, #tpu.memory_space<vmem>>) attributes {dimension_semantics = [#tpu.dimension_semantics<parallel>], iteration_bounds = array<i64: 1>, scalar_prefetch = 0 : i64, scratch_operands = 0 : i64, tpu.core_type = #tpu.core_type<tc>, window_params = [{transform_indices = @transform_0, window_bounds = array<i64: 128, 128>}, {pipeline_mode = #tpu.pipeline_mode<synchronous>, transform_indices = @transform_1, window_bounds = array<i64: 128, 128>}, {transform_indices = @transform_2, window_bounds = array<i64: 128, 128>}]} {
    %c0 = arith.constant 0 : index
    %c0_0 = arith.constant 0 : index
    %0 = vector.load %arg1[%c0, %c0_0] : memref<128x128xbf16, #tpu.memory_space<vmem>>, vector<128x128xbf16>
    %c0_1 = arith.constant 0 : index
    %c0_2 = arith.constant 0 : index
    %1 = vector.load %arg2[%c0_1, %c0_2] : memref<128x128xbf16, #tpu.memory_space<vmem>>, vector<128x128xbf16>
    %cst = arith.constant dense<0.000000e+00> : vector<128x128xf32>
    %2 = tpu.matmul %0, %1, %cst {dimension_numbers = #tpu.dot_dimension_numbers<[1], [0], [0], [1], [0, 0, 1, 1], [], []>} : vector<128x128xbf16>, vector<128x128xbf16>, vector<128x128xf32> -> vector<128x128xf32>
    %3 = arith.truncf %2 : vector<128x128xf32> to vector<128x128xbf16>
    %c0_3 = arith.constant 0 : index
    %c0_4 = arith.constant 0 : index
    %4 = vector.load %arg3[%c0_3, %c0_4] : memref<128x128xbf16, #tpu.memory_space<vmem>>, vector<128x128xbf16>
    tpu.vector_store %arg3[%c0_3, %c0_4], %3 {strides = array<i32>} : memref<128x128xbf16, #tpu.memory_space<vmem>>, vector<128x128xbf16>,
    return
  }
  func.func @transform_0(%arg0: i32) -> (i32, i32) {
    %c0_i32 = arith.constant 0 : i32
    %c0_i32_0 = arith.constant 0 : i32
    return %arg0, %c0_i32 : i32, i32
  }
  func.func @transform_1(%arg0: i32) -> (i32, i32) {
    %c0_i32 = arith.constant 0 : i32
    %c0_i32_0 = arith.constant 0 : i32
    %c0_i32_1 = arith.constant 0 : i32
    return %c0_i32, %c0_i32_0 : i32, i32
  }
  func.func @transform_2(%arg0: i32) -> (i32, i32) {
    %c0_i32 = arith.constant 0 : i32
    %c0_i32_0 = arith.constant 0 : i32
    return %arg0, %c0_i32 : i32, i32
  }
}

</mosaic_0001>

<bundles_post_ra>
// kernel: tpu_custom_call.1
= control target key start
LH: loop header
LB: loop body
LE: loop exit
PB: predicated region body
PF: predicated region fallthrough
CT: control target
= control target key end

     0   :  { %7 = vsyncpa [#allocation3], 0  ;;  %s681_s0 = inlined_call_operand.hbm [shape: bf16[128,128], index: 0, kind: input, shape index: {}]   ;;  %s682_s1 = inlined_call_operand.hbm [shape: bf16[128,128], index: 1, kind: input, shape index: {}]   ;;  %s683_s2 = inlined_call_operand.hbm [shape: bf16[128,128], index: 2, kind: output, shape index: {}]  }
   0x1   :  { %8 = vsyncpa [#allocation6], 0 }
   0x2   :  { %9 = vsyncpa [#allocation4], 0  ;;  %s616_s9 = smov [#allocation2]   ;;  %s544_s13 = scalar_lea.hbm %s681_s0, 1024 }
   0x3   :  { %s15_s10 = sshll.u32 %s616_s9, 4  ;;  %p545_p0 = scmp.ne.s32.totalorder %s681_s0, %s544_s13  ;;  %s16_s10 = int_to_ptr.vmem [resolvable:$true] %s15_s10 }
   0x4   :  { %p548_p1 = scmp.lt.u32.totalorder %s544_s13, %s681_s0 }
   0x6   :  { %p550_p2 = pnand %p548_p1, %p545_p0 }
   0x8   :  { %553 = shalt.err (!%p550_p2)
}
   0x9   :  { %s554_s18 = scalar_lea.vmem %s16_s10, 1024  ;;  %p559_p4 = scmp.lt.s32.totalorder %s16_s10, %s16_s10 }
   0xa   :  { %p555_p3 = scmp.ne.s32.totalorder %s16_s10, %s554_s18  ;;  %p560_p5 = scmp.lt.s32.totalorder %s554_s18, %s554_s18 }
   0xc   :  { %p561_p6 = por %p560_p5, %p559_p4 }
   0xe   :  { %p562_p7 = pnand %p561_p6, %p555_p3 }
  0x10   :  { %565 = shalt.err (!%p562_p7)
}
  0x11   :  { %s617_s19 = smov 64   ;;  %s618_s20 = smov 4  }
  0x12   :  { %21 = dma.hbm_to_vmem [thread:$0]  %s681_s0, 1024, %s16_s10, [#allocation3], %s617_s19, %s617_s19, %s618_s20  }
  0x13   :  { %s619_s23 = smov [#allocation5]   ;;  %s566_s27 = scalar_lea.hbm %s682_s1, 1024 }
  0x14   :  { %s27_s24 = sshll.u32 %s619_s23, 4  ;;  %p567_p8 = scmp.ne.s32.totalorder %s682_s1, %s566_s27  ;;  %s28_s24 = int_to_ptr.vmem [resolvable:$true] %s27_s24 }
  0x15   :  { %p570_p9 = scmp.lt.u32.totalorder %s566_s27, %s682_s1 }
  0x17   :  { %p572_p10 = pnand %p570_p9, %p567_p8 }
  0x19   :  { %575 = shalt.err (!%p572_p10)
}
  0x1a   :  { %s576_s4 = scalar_lea.vmem %s28_s24, 1024  ;;  %p581_p12 = scmp.lt.s32.totalorder %s28_s24, %s28_s24 }
  0x1b   :  { %p577_p11 = scmp.ne.s32.totalorder %s28_s24, %s576_s4  ;;  %p582_p13 = scmp.lt.s32.totalorder %s576_s4, %s576_s4 }
  0x1d   :  { %p583_p0 = por %p582_p13, %p581_p12 }
  0x1f   :  { %p584_p1 = pnand %p583_p0, %p577_p11 }
  0x21   :  { %587 = shalt.err (!%p584_p1)
}
  0x22   :  { %33 = dma.hbm_to_vmem [thread:$0]  %s682_s1, 1024, %s28_s24, [#allocation6], %s617_s19, %s617_s19, %s618_s20  }
  0x23   :  { %610 = dma.done.wait [#allocation3], 1024  }
  0x24   :  { %611 = vsyncadd [#allocation3], 4294966272 }
  0x25   :  { %612 = dma.done.wait [#allocation6], 1024  }
  0x26   :  { %613 = vsyncadd [#allocation6], 4294966272  ;;  %v528_v0 = vld [vmem:[#allocation5] sm:$0xff]   ;;  %v529_v1 = vld [vmem:[#allocation5 + $0x8] sm:$0xff]   ;;  %s620_s1 = smov [#allocation7]  }
  0x27   :  { %475 = vmatprep.subr.bf16.mxu0 %v528_v0  ;;  %507 = vmatprep.subr.bf16.mxu1 %v528_v0  ;;  %v530_v2 = vld [vmem:[#allocation5 + $0x10] sm:$0xff]   ;;  %v531_v3 = vld [vmem:[#allocation5 + $0x18] sm:$0xff]   ;;  %v536_v4 = vld [vmem:[#allocation2] sm:$0xff]   ;;  %s351_s6 = sshll.u32 %s620_s1, 4  ;;  %s352_s6 = int_to_ptr.vmem [resolvable:$true] %s351_s6 }
  0x28   :  { %476 = vmatpush3.bf16.msra.mxu0 %v528_v0  ;;  %515 = vmatpush3.bf16.msra.mxu1 %v528_v0  ;;  %v537_v5 = vld [vmem:[#allocation2 + $0x20] sm:$0xff]   ;;  %v533_v7 = vld [vmem:[#allocation5 + $0x28] sm:$0xff]   ;;  %v534_v8 = vld [vmem:[#allocation5 + $0x30] sm:$0xff]   ;;  %s588_s7 = scalar_lea.vmem %s352_s6, 1024  ;;  %p593_p3 = scmp.lt.s32.totalorder %s352_s6, %s352_s6 }
  0x29   :  { %477 = vmatprep.subr.bf16.mxu0 %v529_v1  ;;  %508 = vmatprep.subr.bf16.mxu1 %v529_v1  ;;  %v532_v6 = vld [vmem:[#allocation5 + $0x20] sm:$0xff]   ;;  %v535_v9 = vld [vmem:[#allocation5 + $0x38] sm:$0xff]   ;;  %v538_v10 = vld [vmem:[#allocation2 + $0x8] sm:$0xff]   ;;  %p589_p2 = scmp.ne.s32.totalorder %s352_s6, %s588_s7  ;;  %p594_p4 = scmp.lt.s32.totalorder %s588_s7, %s588_s7 }
  0x2a   :  { %491 = vmatprep.mubr.bf16.mxu0 %v536_v4  ;;  %499 = vmatprep.mubr.bf16.mxu1 %v537_v5  ;;  %v539_v11 = vld [vmem:[#allocation2 + $0x28] sm:$0xff]   ;;  %v540_v12 = vld [vmem:[#allocation2 + $0x10] sm:$0xff]   ;;  %v542_v14 = vld [vmem:[#allocation2 + $0x18] sm:$0xff]  }
  0x2b   :  { %v541_v13 = vld [vmem:[#allocation2 + $0x30] sm:$0xff]   ;;  %v543_v15 = vld [vmem:[#allocation2 + $0x38] sm:$0xff]   ;;  %p595_p5 = por %p594_p4, %p593_p3 }
  0x2c   :  { %478 = vmatpush3.bf16.msra.mxu0 %v529_v1  ;;  %516 = vmatpush3.bf16.msra.mxu1 %v529_v1 }
  0x2d   :  { %479 = vmatprep.subr.bf16.mxu0 %v530_v2  ;;  %509 = vmatprep.subr.bf16.mxu1 %v530_v2  ;;  %p596_p6 = pnand %p595_p5, %p589_p2 }
  0x30   :  { %480 = vmatpush3.bf16.msra.mxu0 %v530_v2  ;;  %517 = vmatpush3.bf16.msra.mxu1 %v530_v2 }
  0x31   :  { %481 = vmatprep.subr.bf16.mxu0 %v531_v3  ;;  %510 = vmatprep.subr.bf16.mxu1 %v531_v3 }
  0x34   :  { %482 = vmatpush3.bf16.msra.mxu0 %v531_v3  ;;  %518 = vmatpush3.bf16.msra.mxu1 %v531_v3 }
  0x35   :  { %483 = vmatprep.subr.bf16.mxu0 %v532_v6  ;;  %511 = vmatprep.subr.bf16.mxu1 %v532_v6 }
  0x38   :  { %484 = vmatpush3.bf16.msra.mxu0 %v532_v6  ;;  %519 = vmatpush3.bf16.msra.mxu1 %v532_v6 }
  0x39   :  { %485 = vmatprep.subr.bf16.mxu0 %v533_v7  ;;  %512 = vmatprep.subr.bf16.mxu1 %v533_v7 }
  0x3c   :  { %486 = vmatpush3.bf16.msra.mxu0 %v533_v7  ;;  %520 = vmatpush3.bf16.msra.mxu1 %v533_v7 }
  0x3d   :  { %487 = vmatprep.subr.bf16.mxu0 %v534_v8  ;;  %513 = vmatprep.subr.bf16.mxu1 %v534_v8 }
  0x40   :  { %488 = vmatpush3.bf16.msra.mxu0 %v534_v8  ;;  %521 = vmatpush3.bf16.msra.mxu1 %v534_v8 }
  0x41   :  { %489 = vmatprep.subr.bf16.mxu0 %v535_v9  ;;  %514 = vmatprep.subr.bf16.mxu1 %v535_v9 }
  0x44   :  { %490 = vmatpush3.bf16.msra.mxu0 %v535_v9  ;;  %522 = vmatpush3.bf16.msra.mxu1 %v535_v9 }
  0x47   :  { %492 = vmatmul.mubr.bf16.vlgmr.msra.gmra.mrb[0].mxu0 %v538_v10  ;;  %500 = vmatmul.mubr.bf16.vlgmr.msra.gmra.mrb[0].mxu1 %v539_v11 }
  0x48   :  { %495 = vmatprep.mubr.bf16.mxu0 %v540_v12  ;;  %503 = vmatprep.mubr.bf16.mxu1 %v541_v13 }
  0x4f   :  { %496 = vmatmul.mubr.bf16.gmra.mrb[4].mxu0 %v542_v14  ;;  %504 = vmatmul.mubr.bf16.gmra.mrb[4].mxu1 %v543_v15 }
 0x11a   :  { %v493_v16 = vpop.f32.mrb[0].mxu0  ;;  %v501_v17 = vpop.f32.mrb[0].mxu1 }
 0x11b   :  { %v203_v18 = vpop.f32.mrb[1].mxu0  ;;  %v235_v19 = vpop.f32.mrb[1].mxu1 }
 0x11c   :  { %v494_v20 = vpop.f32.mrb[2].mxu0  ;;  %v502_v21 = vpop.f32.mrb[2].mxu1 }
 0x11d   :  { %v420_v22 = vpack.c.bf16 %v494_v20, %v493_v16  ;;  %v440_v23 = vpack.c.bf16 %v502_v21, %v501_v17  ;;  %v206_v24 = vpop.f32.mrb[3].mxu0  ;;  %v238_v25 = vpop.f32.mrb[3].mxu1 }
 0x11e   :  { %v415_v26 = vpack.c.bf16 %v206_v24, %v203_v18  ;;  %v435_v27 = vpack.c.bf16 %v238_v25, %v235_v19 }
 0x11f   :  { %452 = vst [vmem:[#allocation7 + $0x8] sm:$0xff] %v420_v22   ;;  %456 = vst [vmem:[#allocation7 + $0x28] sm:$0xff] %v440_v23  }
 0x120   :  { %416 = vst [vmem:[#allocation7] sm:$0xff] %v415_v26   ;;  %455 = vst [vmem:[#allocation7 + $0x20] sm:$0xff] %v435_v27  }
 0x122   :  { %v497_v28 = vpop.f32.mrb[4].mxu0  ;;  %v505_v29 = vpop.f32.mrb[4].mxu1 }
 0x123   :  { %v219_v30 = vpop.f32.mrb[5].mxu0  ;;  %v251_v31 = vpop.f32.mrb[5].mxu1 }
 0x124   :  { %v498_v32 = vpop.f32.mrb[6].mxu0  ;;  %v506_v33 = vpop.f32.mrb[6].mxu1 }
 0x125   :  { %v430_v34 = vpack.c.bf16 %v498_v32, %v497_v28  ;;  %v450_v35 = vpack.c.bf16 %v506_v33, %v505_v29  ;;  %v222_v36 = vpop.f32.mrb[7].mxu0  ;;  %v254_v37 = vpop.f32.mrb[7].mxu1 }
 0x126   :  { %v425_v38 = vpack.c.bf16 %v222_v36, %v219_v30  ;;  %v445_v39 = vpack.c.bf16 %v254_v37, %v251_v31 }
 0x127   :  { %454 = vst [vmem:[#allocation7 + $0x18] sm:$0xff] %v430_v34   ;;  %458 = vst [vmem:[#allocation7 + $0x38] sm:$0xff] %v450_v35  }
 0x128   :  { %453 = vst [vmem:[#allocation7 + $0x10] sm:$0xff] %v425_v38   ;;  %457 = vst [vmem:[#allocation7 + $0x30] sm:$0xff] %v445_v39  }
 0x129   :  { %599 = shalt.err (!%p596_p6)
}
 0x12a   :  { %s600_s10 = scalar_lea.hbm %s683_s2, 1024 }
 0x12b   :  { %p601_p7 = scmp.ne.s32.totalorder %s683_s2, %s600_s10  ;;  %p604_p8 = scmp.lt.u32.totalorder %s600_s10, %s683_s2 }
 0x12d   :  { %p606_p9 = pnand %p604_p8, %p601_p7 }
 0x12f   :  { %609 = shalt.err (!%p606_p9)
}
 0x130   :  { %357 = dma.vmem_to_hbm [thread:$0]  %s352_s6, 1024, %s683_s2, [#allocation4], %s617_s19, %s617_s19, %s618_s20  }
 0x131   :  { %614 = dma.done.wait [#allocation4], 1024  }
 0x132   :  { %615 = vsyncadd [#allocation4], 4294966272 }
 0x133   :  { %361 = vsyncpa [#allocation3], 1 }
 0x134   :  { %362 = vsyncpa [#allocation6], 1 }
 0x135   :  { %363 = vsyncpa [#allocation4], 1 }

</bundles_post_ra>
